<compile_context>
chip_gen: v6e
topology: v6e:2x2x1
jax: 0.10.0
libtpu: 0.0.40
codegen_flags: <defaults>
</compile_context>

<pallas_src>
import jax
import jax.numpy as jnp
from jax.experimental import pallas as pl
from jax.experimental.pallas import tpu as pltpu


def mlp_kernel(x_ref, w1_ref, b1_ref, w2r_ref, b2_ref, o_ref):
    x = x_ref[...]                         # (B, D)   f32, VMEM
    w1 = w1_ref[...]                       # (D, Hp)  f32, VMEM (H padded to 128)
    b1 = b1_ref[...]                       # (1, Hp)  f32, VMEM
    w2_row = w2r_ref[...]                  # (1, Hp)  f32, VMEM (W2^T, padded)
    b2 = b2_ref[0, 0]                      # scalar   f32, SMEM

    # Layer 1 on the MXU + ELU (alpha = 1.0, matches F.elu default).
    h = jnp.dot(x, w1, preferred_element_type=jnp.float32) + b1
    h = jnp.where(h > 0, h, jnp.exp(jnp.minimum(h, 0.0)) - 1.0)

    # Layer 2 (H x 1) as a cross-lane reduction — not worth an MXU pass.
    z = jnp.sum(h * w2_row, axis=-1, keepdims=True) + b2   # (B, 1)

    o_ref[...] = jax.nn.sigmoid(z)


def net_forward(x, w1, b1, w2, b2, *, lane_pad=128):
    """x: (B, D); w1: (D, H); b1: (1, H); w2: (H, 1); b2: (1, 1)."""
    B, D = x.shape
    H = w1.shape[1]
    O = w2.shape[1]
    assert O == 1, "layer-2 reduction path assumes a single output unit"

    # Pad the hidden dim to a full lane width; zeros are mathematically inert.
    Hp = max(lane_pad, H)
    w1_p = jnp.zeros((D, Hp), jnp.float32).at[:, :H].set(w1)
    b1_p = jnp.zeros((1, Hp), jnp.float32).at[:, :H].set(b1)
    w2_row = jnp.zeros((1, Hp), jnp.float32).at[:, :H].set(w2.T)   # (1, Hp)
    b2_s = b2.reshape(1, 1).astype(jnp.float32)                     # SMEM scalar

    return pl.pallas_call(
        mlp_kernel,
        out_shape=jax.ShapeDtypeStruct((B, O), jnp.float32),
        in_specs=[
            pl.BlockSpec(memory_space=pltpu.MemorySpace.VMEM),   # x
            pl.BlockSpec(memory_space=pltpu.MemorySpace.VMEM),   # w1 (padded)
            pl.BlockSpec(memory_space=pltpu.MemorySpace.VMEM),   # b1 (padded)
            pl.BlockSpec(memory_space=pltpu.MemorySpace.VMEM),   # w2 row (padded)
            pl.BlockSpec(memory_space=pltpu.MemorySpace.SMEM),   # b2 scalar
        ],
        out_specs=pl.BlockSpec(memory_space=pltpu.MemorySpace.VMEM),
    )(x, w1_p, b1_p, w2_row, b2_s)


def init_params(key, n_input_dim, n_hidden, n_output):
    # Deterministic init mimicking nn.Linear's U(-1/sqrt(fan_in), 1/sqrt(fan_in)).
    k1, k2, k3, k4 = jax.random.split(key, 4)
    lim1 = 1.0 / jnp.sqrt(n_input_dim)
    lim2 = 1.0 / jnp.sqrt(n_hidden)
    w1 = jax.random.uniform(k1, (n_input_dim, n_hidden), jnp.float32, -lim1, lim1)
    b1 = jax.random.uniform(k2, (1, n_hidden), jnp.float32, -lim1, lim1)
    w2 = jax.random.uniform(k3, (n_hidden, n_output), jnp.float32, -lim2, lim2)
    b2 = jax.random.uniform(k4, (1, n_output), jnp.float32, -lim2, lim2)
    return w1, b1, w2, b2


if __name__ == "__main__":
    n_input_dim, n_hidden, n_output = 32, 10, 1
    batch = 8

    key = jax.random.PRNGKey(0)
    kx, kp = jax.random.split(key)
    x = jax.random.normal(kx, (batch, n_input_dim), jnp.float32)
    w1, b1, w2, b2 = init_params(kp, n_input_dim, n_hidden, n_output)

    out = net_forward(x, w1, b1, w2, b2)
    out = jax.block_until_ready(out)

    # Pure-JAX reference (unpadded params).
    h_ref = x @ w1 + b1
    h_ref = jnp.where(h_ref > 0, h_ref, jnp.exp(h_ref) - 1.0)
    ref = jax.nn.sigmoid(h_ref @ w2 + b2)
    assert out.shape == (batch, n_output)
    assert jnp.allclose(out, ref, atol=1e-5), "mismatch vs reference"

    print("KERNEL_OK")
</pallas_src>

<mosaic_0001>
module attributes {stable_mosaic.version = 11 : i64} {
  func.func @mlp_kernel(%arg0: memref<8x32xf32, #tpu.memory_space<vmem>>, %arg1: memref<32x128xf32, #tpu.memory_space<vmem>>, %arg2: memref<1x128xf32, #tpu.memory_space<vmem>>, %arg3: memref<1x128xf32, #tpu.memory_space<vmem>>, %arg4: memref<1x1xf32, #tpu.memory_space<smem>>, %arg5: memref<8x1xf32, #tpu.memory_space<vmem>>) attributes {dimension_semantics = [], scalar_prefetch = 0 : i64, scratch_operands = 0 : i64, tpu.core_type = #tpu.core_type<tc>} {
    %c0 = arith.constant 0 : index
    %c0_0 = arith.constant 0 : index
    %0 = vector.load %arg0[%c0, %c0_0] : memref<8x32xf32, #tpu.memory_space<vmem>>, vector<8x32xf32>
    %c0_1 = arith.constant 0 : index
    %c0_2 = arith.constant 0 : index
    %1 = vector.load %arg1[%c0_1, %c0_2] : memref<32x128xf32, #tpu.memory_space<vmem>>, vector<32x128xf32>
    %c0_3 = arith.constant 0 : index
    %c0_4 = arith.constant 0 : index
    %2 = vector.load %arg2[%c0_3, %c0_4] : memref<1x128xf32, #tpu.memory_space<vmem>>, vector<1x128xf32>
    %c0_5 = arith.constant 0 : index
    %c0_6 = arith.constant 0 : index
    %3 = vector.load %arg3[%c0_5, %c0_6] : memref<1x128xf32, #tpu.memory_space<vmem>>, vector<1x128xf32>
    %c0_7 = arith.constant 0 : index
    %c0_8 = arith.constant 0 : index
    %4 = memref.load %arg4[%c0_7, %c0_8] : memref<1x1xf32, #tpu.memory_space<smem>>
    %cst = arith.constant dense<0.000000e+00> : vector<8x128xf32>
    %5 = tpu.matmul %0, %1, %cst {dimension_numbers = #tpu.dot_dimension_numbers<[1], [0], [0], [1], [0, 0, 1, 1], [], []>} : vector<8x32xf32>, vector<32x128xf32>, vector<8x128xf32> -> vector<8x128xf32>
    %6 = vector.broadcast %2 : vector<1x128xf32> to vector<8x128xf32>
    %7 = arith.addf %5, %6 : vector<8x128xf32>
    %cst_9 = arith.constant 0.000000e+00 : f32
    %8 = vector.broadcast %cst_9 : f32 to vector<8x128xf32>
    %9 = arith.cmpf ogt, %7, %8 : vector<8x128xf32>
    %cst_10 = arith.constant 0.000000e+00 : f32
    %10 = vector.broadcast %cst_10 : f32 to vector<8x128xf32>
    %11 = arith.minimumf %7, %10 : vector<8x128xf32>
    %12 = math.exp %11 : vector<8x128xf32>
    %cst_11 = arith.constant 1.000000e+00 : f32
    %13 = vector.broadcast %cst_11 : f32 to vector<8x128xf32>
    %14 = arith.subf %12, %13 : vector<8x128xf32>
    %15 = arith.select %9, %7, %14 : vector<8x128xi1>, vector<8x128xf32>
    %16 = vector.broadcast %3 : vector<1x128xf32> to vector<8x128xf32>
    %17 = arith.mulf %15, %16 : vector<8x128xf32>
    %cst_12 = arith.constant dense<0.000000e+00> : vector<8xf32>
    %18 = vector.multi_reduction <add>, %17, %cst_12 [1] : vector<8x128xf32> to vector<8xf32>
    %19 = vector.shape_cast %18 : vector<8xf32> to vector<8x1xf32>
    %20 = vector.broadcast %4 : f32 to vector<8x1xf32>
    %21 = arith.addf %19, %20 : vector<8x1xf32>
    %22 = arith.negf %21 : vector<8x1xf32>
    %23 = math.exp %22 : vector<8x1xf32>
    %cst_13 = arith.constant 1.000000e+00 : f32
    %24 = vector.broadcast %cst_13 : f32 to vector<8x1xf32>
    %25 = arith.addf %24, %23 : vector<8x1xf32>
    %26 = arith.divf %24, %25 : vector<8x1xf32>
    %c0_14 = arith.constant 0 : index
    %c0_15 = arith.constant 0 : index
    %27 = vector.load %arg5[%c0_14, %c0_15] : memref<8x1xf32, #tpu.memory_space<vmem>>, vector<8x1xf32>
    tpu.vector_store %arg5[%c0_14, %c0_15], %26 {strides = array<i32>} : memref<8x1xf32, #tpu.memory_space<vmem>>, vector<8x1xf32>,
    return
  }
}

</mosaic_0001>

<bundles_post_ra>
// kernel: tpu_custom_call.1
= control target key start
LH: loop header
LB: loop body
LE: loop exit
PB: predicated region body
PF: predicated region fallthrough
CT: control target
= control target key end

     0   :  { %11 = vsyncpa [#allocation4], 0  ;;  %s297_s0 = inlined_call_operand.hbm [shape: f32[8,32], index: 0, kind: input, shape index: {}]   ;;  %s298_s1 = inlined_call_operand.hbm [shape: f32[32,128], index: 1, kind: input, shape index: {}]   ;;  %s299_s2 = inlined_call_operand.vmem [shape: f32[1,128], index: 2, kind: input, shape index: {}]   ;;  %s300_s3 = inlined_call_operand.vmem [shape: f32[1,128], index: 3, kind: input, shape index: {}]   ;;  %s301_s4 = inlined_call_operand.<no memory space> [shape: f32[1,1], index: 4, kind: input, shape index: {}]   ;;  %s302_s5 = inlined_call_operand.vmem [shape: f32[8,1], index: 5, kind: output, shape index: {}]  }
   0x1   :  { %12 = vsyncpa [#allocation6], 0  ;;  %s243_s18 = smov [#allocation3]   ;;  %s244_s20 = smov [#allocation5]  }
   0x2   :  { %s19_s19 = sshll.u32 %s243_s18, 4  ;;  %s28_s21 = sshll.u32 %s244_s20, 4  ;;  %s20_s19 = int_to_ptr.vmem [resolvable:$true] %s19_s19  ;;  %s29_s21 = int_to_ptr.vmem [resolvable:$true] %s28_s21 }
   0x3   :  { %s207_s22 = scalar_lea.vmem %s20_s19, 128  ;;  %p212_p1 = scmp.lt.s32.totalorder %s20_s19, %s20_s19 }
   0x4   :  { %p208_p0 = scmp.ne.s32.totalorder %s20_s19, %s207_s22  ;;  %p213_p2 = scmp.lt.s32.totalorder %s207_s22, %s207_s22 }
   0x6   :  { %p214_p3 = por %p213_p2, %p212_p1 }
   0x8   :  { %p215_p4 = pnand %p214_p3, %p208_p0 }
   0xa   :  { %218 = shalt.err (!%p215_p4)
}
   0xb   :  { %22 = dma.hbm_to_vmem [thread:$0]  %s297_s0, 128, %s20_s19, [#allocation4]  }
   0xc   :  { %s227_s25 = scalar_lea.vmem %s29_s21, 512  ;;  %p232_p6 = scmp.lt.s32.totalorder %s29_s21, %s29_s21 }
   0xd   :  { %p228_p5 = scmp.ne.s32.totalorder %s29_s21, %s227_s25  ;;  %p233_p7 = scmp.lt.s32.totalorder %s227_s25, %s227_s25 }
   0xf   :  { %p234_p8 = por %p233_p7, %p232_p6 }
  0x11   :  { %p235_p9 = pnand %p234_p8, %p228_p5 }
  0x13   :  { %238 = shalt.err (!%p235_p9)
}
  0x14   :  { %s245_s26 = smov 128   ;;  %s246_s27 = smov 8  }
  0x15   :  { %34 = dma.hbm_to_vmem [thread:$0]  %s298_s1, 512, %s29_s21, [#allocation6], %s245_s26, %s245_s26, %s246_s27  }
  0x16   :  { %239 = dma.done.wait [#allocation4], 128  }
  0x17   :  { %240 = vsyncadd [#allocation4], 4294967168 }
  0x18   :  { %241 = dma.done.wait [#allocation6], 512  }
  0x19   :  { %242 = vsyncadd [#allocation6], 4294966784  ;;  %v247_v0 = vmov 0.0   ;;  %vm248_vm0 = vmmov 0   ;;  %v51_v1 = vld [vmem:[#allocation5 + $0x18] sm:$0xff]  ;;  %v50_v2 = vld [vmem:[#allocation5 + $0x10] sm:$0xff]  ;;  %v150_v17 = vstv %s301_s4 }
  0x1a   :  { %176 = vmatprep.subr.mxu0 %v247_v0  ;;  %184 = vmatprep.mubr.msk.f32.mxu0 %vm248_vm0, %v247_v0  ;;  %v49_v3 = vld [vmem:[#allocation5 + $0x8] sm:$0xff]  ;;  %v48_v4 = vld [vmem:[#allocation5] sm:$0xff]  ;;  %v47_v5 = vld [vmem:[#allocation3] sm:$0xff]  ;;  %vm61_vm1 = vcmask 261120   ;;  %vm158_vm3 = vcmask 7168  }
  0x1b   :  { %177 = vmatpush3.msra.mxu0 %v51_v1  ;;  %v166_v6 = vld [vmem:[%s299_s2] ss:$0 sm:$0xff] }
  0x1c   :  { %178 = vmatprep.subr.mxu0 %v247_v0  ;;  %v169_v13 = vld [vmem:[%s300_s3] ss:$0 sm:$0xff] }
  0x1d   :  { %179 = vmatpush3.msra.mxu0 %v50_v2 }
  0x1e   :  { %180 = vmatprep.subr.mxu0 %v247_v0 }
  0x1f   :  { %181 = vmatpush3.msra.mxu0 %v49_v3 }
  0x20   :  { %182 = vmatprep.subr.mxu0 %v247_v0 }
  0x21   :  { %183 = vmatpush3.msra.mxu0 %v48_v4 }
  0x22   :  { %185 = vmatmul.mubr.msk.f32.vlgmr.msra.gmra.mxu0 %vm61_vm1, %v47_v5 }
  0xe2   :  { %v131_v7 = vpop.f32.mrf.mxu0 }
  0xe3   :  { %v132_v8 = vadd.f32 %v166_v6, %v131_v7 }
  0xe4   :  { %v186_v9 = vpop.f32.mrf.mxu0 }
  0xe5   :  { %v136_v10 = vmin.f32 %v132_v8, 0.0  ;;  %vm135_vm2 = vcmp.gt.f32.partialorder %v132_v8, 0.0 }
  0xe7   :  { %v137_v11 = vmul.f32 1.442695, %v136_v10 }
  0xe9   :  { %193 = vpow2.f32 %v137_v11 }
  0xf6   :  { %v194_v12 = vpop.eup %193 }
  0xf7   :  { %v168_v14 = vadd.f32 -1.0, %v194_v12 }
  0xf9   :  { %v140_v15 = vsel %vm135_vm2, %v132_v8, %v168_v14 }
  0xfa   :  { %v147_v16 = vmul.f32 %v169_v13, %v140_v15 }
  0xfc   :  { %148 = vadd.xlane.f32.xlu0 %v147_v16 }
 0x185   :  { %v149_v18 = vpop.xlane.xlu0 %148 }
 0x186   :  { %v151_v19 = vadd.f32 %v150_v17, %v149_v18 }
 0x188   :  { %v170_v20 = vmul.f32 -1.442695, %v151_v19 }
 0x18a   :  { %195 = vpow2.f32 %v170_v20 }
 0x197   :  { %v196_v21 = vpop.eup %195 }
 0x198   :  { %v155_v22 = vadd.f32 1.0, %v196_v21 }
 0x19a   :  { %197 = vrcp.f32 %v155_v22 }
 0x1a7   :  { %v198_v23 = vpop.eup %197 }
 0x1a8   :  { %159 = vst.msk [vmem:[%s302_s5] sm:$0xff] %vm158_vm3, %v198_v23 }
 0x1a9   :  { %164 = vsyncpa [#allocation4], 1 }
 0x1aa   :  { %165 = vsyncpa [#allocation6], 1 }

</bundles_post_ra>
